<compile_context>
chip_gen: v5e
topology: v5e:2x2
jax: 0.10.0
libtpu: 0.0.40
codegen_flags: <defaults>
</compile_context>

<pallas_src>
import jax
import jax.numpy as jnp
from jax.experimental import pallas as pl
from jax.experimental.pallas import tpu as pltpu


def matvec_kernel(x_ref, w_ref, o_ref):
    # x_ref: (2,) f32 in SMEM (scalars), w_ref: (2, 3) f32 in VMEM,
    # o_ref: (1, 3) f32 in VMEM.
    # out[0, :] = x[0] * W[0, :] + x[1] * W[1, :]
    x0 = x_ref[0]            # sreg scalar
    x1 = x_ref[1]            # sreg scalar
    wv = w_ref[...]          # (2, 3) vreg tile
    # scalar * vreg broadcasts natively on the VPU; sublane slices of W are
    # static and stay within one (8,128) tile.
    o_ref[...] = x0 * wv[0:1, :] + x1 * wv[1:2, :]


def my_model_param_forward(x, w):
    """x: (1, 2) float32, w: (2, 3) float32 -> (1, 3) float32."""
    M, K = x.shape
    K2, N = w.shape
    assert M == 1 and K == 2 and K2 == 2, (x.shape, w.shape)

    x_flat = x.reshape(K)  # (2,) -> SMEM scalar path

    return pl.pallas_call(
        matvec_kernel,
        out_shape=jax.ShapeDtypeStruct((M, N), x.dtype),
        # Gridless: the entire (tiny) operands live on-chip as single blocks.
        in_specs=[
            pl.BlockSpec(memory_space=pltpu.MemorySpace.SMEM),   # x scalars
            pl.BlockSpec(memory_space=pltpu.MemorySpace.VMEM),   # W tile
        ],
        out_specs=pl.BlockSpec(memory_space=pltpu.MemorySpace.VMEM),
        # 6 MACs = 12 flops; bytes = x(8) + W(24) + out(12) = 44.
        cost_estimate=pl.CostEstimate(
            flops=12, transcendentals=0, bytes_accessed=44),
    )(x_flat, w)


if __name__ == "__main__":
    # Deterministic parameter / input initialization matching the PyTorch module:
    #   x = torch.Tensor(1, 2).fill_(0.8)
    #   W = torch.nn.Parameter(torch.Tensor(2, 3).fill_(0.5))
    key = jax.random.PRNGKey(0)  # kept for convention; constants need no randomness
    x = jnp.full((1, 2), 0.8, dtype=jnp.float32)
    W = jnp.full((2, 3), 0.5, dtype=jnp.float32)

    out = my_model_param_forward(x, W)
    out = jax.block_until_ready(out)

    # Reference check in plain JAX (exact f32 path).
    ref = x @ W
    assert out.shape == (1, 3), out.shape
    assert jnp.allclose(out, ref, atol=1e-6), (out, ref)

    # TODO(synk): if M/K/N ever grow, switch to the tiled MXU matmul pattern:
    # lane-dense output (N multiple of 128), tm/tn multiples of 256 on v6e/v7x
    # (128 on v5e), dimension_semantics=("parallel","parallel","arbitrary"),
    # and VMEM tiles budgeted against 64 MiB physical / 32 MiB scoped on v7x.
    print("KERNEL_OK")
</pallas_src>

<mosaic_0001>
module attributes {stable_mosaic.version = 11 : i64} {
  func.func @matvec_kernel(%arg0: memref<2xf32, #tpu.memory_space<smem>>, %arg1: memref<2x3xf32, #tpu.memory_space<vmem>>, %arg2: memref<1x3xf32, #tpu.memory_space<vmem>>) attributes {dimension_semantics = [], scalar_prefetch = 0 : i64, scratch_operands = 0 : i64, tpu.core_type = #tpu.core_type<tc>} {
    %c0 = arith.constant 0 : index
    %0 = memref.load %arg0[%c0] : memref<2xf32, #tpu.memory_space<smem>>
    %c1 = arith.constant 1 : index
    %1 = memref.load %arg0[%c1] : memref<2xf32, #tpu.memory_space<smem>>
    %c0_0 = arith.constant 0 : index
    %c0_1 = arith.constant 0 : index
    %2 = vector.load %arg1[%c0_0, %c0_1] : memref<2x3xf32, #tpu.memory_space<vmem>>, vector<2x3xf32>
    %3 = vector.extract_strided_slice %2 {offsets = [0, 0], sizes = [1, 3], strides = [1, 1]} : vector<2x3xf32> to vector<1x3xf32>
    %4 = vector.broadcast %0 : f32 to vector<1x3xf32>
    %5 = arith.mulf %4, %3 : vector<1x3xf32>
    %6 = vector.extract_strided_slice %2 {offsets = [1, 0], sizes = [1, 3], strides = [1, 1]} : vector<2x3xf32> to vector<1x3xf32>
    %7 = vector.broadcast %1 : f32 to vector<1x3xf32>
    %8 = arith.mulf %7, %6 : vector<1x3xf32>
    %9 = arith.addf %5, %8 : vector<1x3xf32>
    %c0_2 = arith.constant 0 : index
    %c0_3 = arith.constant 0 : index
    %10 = vector.load %arg2[%c0_2, %c0_3] : memref<1x3xf32, #tpu.memory_space<vmem>>, vector<1x3xf32>
    tpu.vector_store %arg2[%c0_2, %c0_3], %9 {strides = array<i32>} : memref<1x3xf32, #tpu.memory_space<vmem>>, vector<1x3xf32>,
    return
  }
}

</mosaic_0001>

<bundles_post_ra>
// kernel: tpu_custom_call.1
= control target key start
LH: loop header
LB: loop body
LE: loop exit
PB: predicated region body
PF: predicated region fallthrough
CT: control target
= control target key end

     0   :  { %7 = vsyncpa [#allocation5], 0  ;;  %s167_s0 = inlined_call_operand.hbm [shape: f32[2], index: 0, kind: input, shape index: {}]   ;;  %s168_s1 = inlined_call_operand.hbm [shape: f32[2,3], index: 1, kind: input, shape index: {}]   ;;  %s169_s2 = inlined_call_operand.hbm [shape: f32[1,3], index: 2, kind: output, shape index: {}]  }
   0x1   :  { %8 = vsyncpa [#allocation3], 0 }
   0x2   :  { %9 = vsyncpa [#allocation4], 0  ;;  %s15_s11 = sshll.u32 %s167_s0, 4  ;;  %s24_s14 = sshll.u32 %s168_s1, 4  ;;  %s16_s11 = int_to_ptr.hbm [resolvable:$true] %s15_s11  ;;  %s25_s14 = int_to_ptr.hbm [resolvable:$true] %s24_s14 }
   0x3   :  { %s140_s15 = smov [#allocation2]   ;;  %s141_s16 = smov [#allocation6]  }
   0x4   :  { %18 = dma.hbm_to_smem %s16_s11, 16, %s140_s15, [#allocation5]  }
   0x5   :  { %s26_s17 = sshll.u32 %s141_s16, 4  ;;  %s27_s17 = int_to_ptr.vmem [resolvable:$true] %s26_s17 }
   0x6   :  { %29 = dma.hbm_to_vmem [thread:$0]  %s25_s14, 32, %s27_s17, [#allocation3]  }
   0x7   :  { %134 = dma.done.wait [#allocation5], 16  }
   0x8   :  { %135 = vsyncadd [#allocation5], 4294967280 }
   0x9   :  { %136 = dma.done.wait [#allocation3], 32  }
   0xa   :  { %137 = vsyncadd [#allocation3], 4294967264 }
   0xb   :  { %38 = sfence }
   0xc   :  { %s39_s18 = sld [smem:[#allocation2]]  ;;  %v41_v0 = vld [vmem:[#allocation6] sm:$0x3]  ;;  %s142_s0 = smov [#allocation7]   ;;  %vm50_vm0 = vcmask 16384  }
   0xd   :  { %s70_s19 = sld [smem:[#allocation2 + $0x1]]  ;;  %s57_s1 = sshll.u32 %s142_s0, 4  ;;  %s58_s1 = int_to_ptr.vmem [resolvable:$true] %s57_s1 }
   0xe   :  { %s59_s22 = sshll.u32 %s169_s2, 4  ;;  %s60_s22 = int_to_ptr.hbm [resolvable:$true] %s59_s22 }
  0x12   :  { %v42_v1 = vstv %s39_s18 }
  0x13   :  { %v44_v2 = vstv %s70_s19  ;;  %v43_v3 = vmul.f32 %v42_v1, %v41_v0 }
  0x14   :  { %v45_v4 = vmul.f32 %v44_v2, %v41_v0 }
  0x16   :  { %v47_v5 = vrot.slane %v45_v4, 1 }
  0x18   :  { %v49_v6 = vadd.f32 %v47_v5, %v43_v3 }
  0x1a   :  { %51 = vst.msk [vmem:[#allocation7] sm:$0x1] %vm50_vm0, %v49_v6 }
  0x1b   :  { %62 = dma.vmem_to_hbm [thread:$0]  %s58_s1, 16, %s60_s22, [#allocation4]  }
  0x1c   :  { %138 = dma.done.wait [#allocation4], 16  }
  0x1d   :  { %139 = vsyncadd [#allocation4], 4294967280 }
  0x1e   :  { %67 = vsyncpa [#allocation3], 1 }
  0x1f   :  { %68 = vsyncpa [#allocation4], 1 }
  0x20   :  { %69 = vsyncpa [#allocation5], 1 }

</bundles_post_ra>
